<compile_context>
chip_gen: v7x
topology: tpu7x:2x2x1
jax: 0.10.0
libtpu: 0.0.40
codegen_flags: <defaults>
</compile_context>

<pallas_src>
import functools

import jax
import jax.numpy as jnp
from jax.experimental import pallas as pl
from jax.experimental.pallas import tpu as pltpu


# --------------------------------------------------------------------------
# Kernel body: two MXU matmuls + EUP tanh, fused, batch on the lane axis.
# --------------------------------------------------------------------------
def _mlp_tanh_kernel(xt_ref, w1_ref, b1_ref, w2_ref, b2_ref, yt_ref):
    xt = xt_ref[...]     # [D, tb]   batch on lanes
    w1 = w1_ref[...]     # [H, D]    native nn.Linear layout (resident)
    b1 = b1_ref[...]     # [H, 1]
    w2 = w2_ref[...]     # [O, H]    (resident)
    b2 = b2_ref[...]     # [O, 1]

    h = jnp.dot(w1, xt,
                preferred_element_type=jnp.float32,
                precision=jax.lax.Precision.HIGHEST) + b1        # [H, tb]
    h = jnp.tanh(h)                                              # lane-dense EUP
    y = jnp.dot(w2, h,
                preferred_element_type=jnp.float32,
                precision=jax.lax.Precision.HIGHEST) + b2        # [O, tb]
    yt_ref[...] = y.astype(yt_ref.dtype)                         # unmasked vst


# --------------------------------------------------------------------------
# Tile sizing: double-buffered streamed tiles must fit the v7x scoped-VMEM
# default (32 MiB) with headroom; weights/biases are tiny and resident.
# --------------------------------------------------------------------------
_VMEM_TILE_BUDGET_BYTES = 24 << 20


def _pick_batch_tile(block_b, d, o):
    per_row_bytes = 2 * (d + o) * 4          # double-buffered x^T + y^T, f32
    cap = _VMEM_TILE_BUDGET_BYTES // per_row_bytes
    tb = min(int(block_b), int(cap))
    return max(128, (tb // 128) * 128)        # lane-aligned batch tile


# --------------------------------------------------------------------------
# Wrapper: layout plumbing (x -> x^T, column biases, y^T -> y) lives here.
# --------------------------------------------------------------------------
@functools.partial(jax.jit, static_argnames=("block_b",))
def dyn_model_net_tanh1(x, w1, b1, w2, b2, *, block_b=32768):
    """Pallas equivalent of DynModelNetTanh1.forward.

    x : [B, D] float32
    w1: [H, D], b1: [H]   (layer_1)
    w2: [O, H], b2: [O]   (layer_2)
    returns [B, O] float32
    """
    B, D = x.shape
    H = w1.shape[0]
    O = w2.shape[0]

    xt = x.T                       # [D, B]  one-time layout flip (wrapper side)
    b1c = b1.reshape(H, 1)
    b2c = b2.reshape(O, 1)

    flops = 2 * B * (D * H + H * O)
    bytes_accessed = 4 * (B * D + D * H + H + H * O + O + B * O)
    cost = pl.CostEstimate(flops=flops,
                           transcendentals=B * H,
                           bytes_accessed=bytes_accessed)
    out_shape = jax.ShapeDtypeStruct((O, B), jnp.float32)

    tb = _pick_batch_tile(block_b, D, O)

    if B <= tb:
        # Small / moderate batch: grid-less launch, whole arrays as single
        # VMEM blocks -- no pipeline prologue, no divisibility constraints.
        yt = pl.pallas_call(
            _mlp_tanh_kernel,
            out_shape=out_shape,
            cost_estimate=cost,
        )(xt, w1, b1c, w2, b2c)
    else:
        # Large batch: stream x^T / y^T tiles HBM<->VMEM; weights & biases use
        # constant index_maps so they stay VMEM-resident across iterations.
        # Ragged final block is masked by Pallas (no wrapper pad/slice).
        num_tiles = pl.cdiv(B, tb)
        yt = pl.pallas_call(
            _mlp_tanh_kernel,
            out_shape=out_shape,
            grid_spec=pl.GridSpec(
                grid=(num_tiles,),
                in_specs=[
                    pl.BlockSpec((D, tb), lambda i: (0, i)),   # x^T tile (streams)
                    pl.BlockSpec((H, D), lambda i: (0, 0)),    # W1 resident
                    pl.BlockSpec((H, 1), lambda i: (0, 0)),    # b1 resident
                    pl.BlockSpec((O, H), lambda i: (0, 0)),    # W2 resident
                    pl.BlockSpec((O, 1), lambda i: (0, 0)),    # b2 resident
                ],
                out_specs=pl.BlockSpec((O, tb), lambda i: (0, i)),
            ),
            compiler_params=pltpu.CompilerParams(
                dimension_semantics=("parallel",),             # dual-TC on v7x
            ),
            cost_estimate=cost,
        )(xt, w1, b1c, w2, b2c)

    return yt.T                    # [B, O]


# --------------------------------------------------------------------------
# Reference + deterministic parameter init (PyTorch nn.Linear-style).
# --------------------------------------------------------------------------
def _ref_forward(x, w1, b1, w2, b2):
    h = jnp.tanh(jnp.dot(x, w1.T, precision=jax.lax.Precision.HIGHEST) + b1)
    return jnp.dot(h, w2.T, precision=jax.lax.Precision.HIGHEST) + b2


def _init_linear_params(key, in_features, out_features):
    kw, kb = jax.random.split(key)
    bound = 1.0 / jnp.sqrt(jnp.float32(in_features))
    w = jax.random.uniform(kw, (out_features, in_features), jnp.float32,
                           minval=-bound, maxval=bound)
    b = jax.random.uniform(kb, (out_features,), jnp.float32,
                           minval=-bound, maxval=bound)
    return w, b


if __name__ == "__main__":
    # Module-consistent small shapes: d=16, width_1=32, out_dim=8, batch=8.
    B, D, H, O = 8, 16, 32, 8

    key = jax.random.PRNGKey(0)
    kx, k1, k2, kx2 = jax.random.split(key, 4)

    x = jax.random.normal(kx, (B, D), jnp.float32)
    w1, b1 = _init_linear_params(k1, D, H)   # layer_1: Linear(d, width_1)
    w2, b2 = _init_linear_params(k2, H, O)   # layer_2: Linear(width_1, out_dim)

    # Path 1: tiny batch -> grid-less fused kernel.
    out = jax.block_until_ready(dyn_model_net_tanh1(x, w1, b1, w2, b2))
    ref = _ref_forward(x, w1, b1, w2, b2)
    assert out.shape == (B, O)
    assert jnp.allclose(out, ref, atol=1e-5, rtol=1e-5), "small-batch mismatch"

    # Path 2: larger, non-aligned batch -> batch-tiled pipeline with a ragged
    # final block (300 = 2*128 + 44), weights resident, batch axis parallel.
    B2 = 300
    x2 = jax.random.normal(kx2, (B2, D), jnp.float32)
    out2 = jax.block_until_ready(
        dyn_model_net_tanh1(x2, w1, b1, w2, b2, block_b=128))
    ref2 = _ref_forward(x2, w1, b1, w2, b2)
    assert out2.shape == (B2, O)
    assert jnp.allclose(out2, ref2, atol=1e-5, rtol=1e-5), "tiled-batch mismatch"

    print("KERNEL_OK")
</pallas_src>

<mosaic_0001>
module attributes {stable_mosaic.version = 11 : i64} {
  func.func @_mlp_tanh_kernel(%arg0: memref<16x8xf32, #tpu.memory_space<vmem>>, %arg1: memref<32x16xf32, #tpu.memory_space<vmem>>, %arg2: memref<32x1xf32, #tpu.memory_space<vmem>>, %arg3: memref<8x32xf32, #tpu.memory_space<vmem>>, %arg4: memref<8x1xf32, #tpu.memory_space<vmem>>, %arg5: memref<8x8xf32, #tpu.memory_space<vmem>>) attributes {dimension_semantics = [], scalar_prefetch = 0 : i64, scratch_operands = 0 : i64, tpu.core_type = #tpu.core_type<tc>} {
    %c0 = arith.constant 0 : index
    %c0_0 = arith.constant 0 : index
    %0 = vector.load %arg0[%c0, %c0_0] : memref<16x8xf32, #tpu.memory_space<vmem>>, vector<16x8xf32>
    %c0_1 = arith.constant 0 : index
    %c0_2 = arith.constant 0 : index
    %1 = vector.load %arg1[%c0_1, %c0_2] : memref<32x16xf32, #tpu.memory_space<vmem>>, vector<32x16xf32>
    %c0_3 = arith.constant 0 : index
    %c0_4 = arith.constant 0 : index
    %2 = vector.load %arg2[%c0_3, %c0_4] : memref<32x1xf32, #tpu.memory_space<vmem>>, vector<32x1xf32>
    %c0_5 = arith.constant 0 : index
    %c0_6 = arith.constant 0 : index
    %3 = vector.load %arg3[%c0_5, %c0_6] : memref<8x32xf32, #tpu.memory_space<vmem>>, vector<8x32xf32>
    %c0_7 = arith.constant 0 : index
    %c0_8 = arith.constant 0 : index
    %4 = vector.load %arg4[%c0_7, %c0_8] : memref<8x1xf32, #tpu.memory_space<vmem>>, vector<8x1xf32>
    %cst = arith.constant dense<0.000000e+00> : vector<32x8xf32>
    %5 = tpu.matmul %1, %0, %cst {dimension_numbers = #tpu.dot_dimension_numbers<[1], [0], [0], [1], [0, 0, 1, 1], [], []>, precision = #tpu.contract_precision<fp32>} : vector<32x16xf32>, vector<16x8xf32>, vector<32x8xf32> -> vector<32x8xf32>
    %6 = vector.broadcast %2 : vector<32x1xf32> to vector<32x8xf32>
    %7 = arith.addf %5, %6 : vector<32x8xf32>
    %8 = math.tanh %7 : vector<32x8xf32>
    %cst_9 = arith.constant dense<0.000000e+00> : vector<8x8xf32>
    %9 = tpu.matmul %3, %8, %cst_9 {dimension_numbers = #tpu.dot_dimension_numbers<[1], [0], [0], [1], [0, 0, 1, 1], [], []>, precision = #tpu.contract_precision<fp32>} : vector<8x32xf32>, vector<32x8xf32>, vector<8x8xf32> -> vector<8x8xf32>
    %10 = vector.broadcast %4 : vector<8x1xf32> to vector<8x8xf32>
    %11 = arith.addf %9, %10 : vector<8x8xf32>
    %c0_10 = arith.constant 0 : index
    %c0_11 = arith.constant 0 : index
    %12 = vector.load %arg5[%c0_10, %c0_11] : memref<8x8xf32, #tpu.memory_space<vmem>>, vector<8x8xf32>
    tpu.vector_store %arg5[%c0_10, %c0_11], %11 {strides = array<i32>} : memref<8x8xf32, #tpu.memory_space<vmem>>, vector<8x8xf32>,
    return
  }
}

</mosaic_0001>

<bundles_post_ra>
// kernel: dyn_model_net_tanh1.1
= control target key start
LH: loop header
LB: loop body
LE: loop exit
PB: predicated region body
PF: predicated region fallthrough
CT: control target
= control target key end

     0   :  { %vm52_vm0 = vcmask 130048   ;;  %v1458_v3 = vmov 0   ;;  %v1459_v50 = vmov 0.0|0.0   ;;  %vm1460_vm1 = vmmov 0   ;;  %s1597_s0 = inlined_call_operand.vmem [shape: f32[16,8], index: 0, kind: input, shape index: {}]   ;;  %s1598_s1 = inlined_call_operand.vmem [shape: f32[32,16], index: 1, kind: input, shape index: {}]   ;;  %s1599_s2 = inlined_call_operand.vmem [shape: f32[32,1], index: 2, kind: input, shape index: {}]   ;;  %s1600_s4 = inlined_call_operand.vmem [shape: f32[8,1], index: 4, kind: input, shape index: {}]   ;;  %s1601_s3 = inlined_call_operand.vmem [shape: f32[8,32], index: 3, kind: input, shape index: {}]   ;;  %s1602_s5 = inlined_call_operand.vmem [shape: f32[8,8], index: 5, kind: output, shape index: {}]  }
   0x1   :  { %v20_v0 = vld [vmem:[%s1597_s0] sm:$0xff]  ;;  %v21_v1 = vld [vmem:[%s1597_s0 + $0x8] sm:$0xff]  ;;  %1448 = vset.pattern.permute.xlu0 %v1458_v3  ;;  %1449 = vset.pattern.permute.xlu1 %v1458_v3  ;;  %v24_v8 = vld [vmem:[%s1598_s1 + $0x10] sm:$0xff]  ;;  %v1461_v51 = vmov 0.0   ;;  %vm662_vm2 = vcmask 261120   ;;  %vm1151_vm3 = vcmask 64512  }
   0x2   :  { %v22_v2 = vld [vmem:[%s1598_s1] sm:$0xff]  ;;  %v66_v4 = vand.u32 4294901760, %v20_v0  ;;  %v69_v5 = vand.u32 4294901760, %v21_v1  ;;  %v23_v7 = vld [vmem:[%s1598_s1 + $0x8] sm:$0xff]  ;;  %v25_v9 = vld [vmem:[%s1598_s1 + $0x18] sm:$0xff]  ;;  %v60_v12 = vsel %vm52_vm0, %v24_v8, 0  ;;  %1373 = vmatprep.subr.bf16.mxu1 %v1459_v50  ;;  %1291 = vmatprep.mubr.msk.f32.mxu1 %vm1460_vm1, %v1461_v51 }
   0x3   :  { %v54_v6 = vsel %vm52_vm0, %v22_v2, 0  ;;  %v57_v11 = vsel %vm52_vm0, %v23_v7, 0  ;;  %v63_v13 = vsel %vm52_vm0, %v25_v9, 0  ;;  %v26_v14 = vld [vmem:[%s1599_s2] sm:$0xff]  ;;  %v28_v19 = vld [vmem:[%s1599_s2 + $0x10] sm:$0xff]  ;;  %v1527_v21 = vand.u32 4294901760, %v60_v12 }
   0x4   :  { %v1511_v10 = vand.u32 4294901760, %v54_v6  ;;  %v1519_v15 = vpack.c.bf16 %v69_v5, %v66_v4  ;;  %v1521_v16 = vand.u32 4294901760, %v57_v11  ;;  %v174_v17 = vsub.f32 %v20_v0, %v66_v4  ;;  %34 = vperm.xlu0 %1448, %v26_v14   ;;  %v27_v23 = vld [vmem:[%s1599_s2 + $0x8] sm:$0xff]  ;;  %44 = vperm.xlu1 %1449, %v28_v19   ;;  %v29_v27 = vld [vmem:[%s1599_s2 + $0x18] sm:$0xff]  ;;  %v31_v37 = vld [vmem:[%s1600_s4] sm:$0xff] }
   0x5   :  { %v181_v18 = vsub.f32 %v21_v1, %v69_v5  ;;  %v1529_v22 = vand.u32 4294901760, %v63_v13  ;;  %v153_v29 = vsub.f32 %v60_v12, %v1527_v21  ;;  %v30_v56 = vld [vmem:[%s1601_s3] sm:$0xff] }
   0x6   :  { %v133_v20 = vsub.f32 %v54_v6, %v1511_v10  ;;  %1350 = vmatprep.subr.bf16.mxu0 %v1519_v15  ;;  %v143_v24 = vsub.f32 %v57_v11, %v1521_v16  ;;  %v175_v25 = vand.u32 4294901760, %v174_v17  ;;  %v664_v60 = vsel %vm662_vm2, %v30_v56, 0 }
   0x7   :  { %v182_v26 = vand.u32 4294901760, %v181_v18  ;;  %1352 = vmatpush3.bf16.msra.mxu0 %v1519_v15  ;;  %v163_v30 = vsub.f32 %v63_v13, %v1529_v22  ;;  %v154_v35 = vand.u32 4294901760, %v153_v29  ;;  %v1357_v46 = vpack.c.bf16 %v181_v18, %v174_v17 }
   0x8   :  { %v134_v28 = vand.u32 4294901760, %v133_v20  ;;  %v144_v31 = vand.u32 4294901760, %v143_v24  ;;  %v176_v32 = vsub.f32 %v174_v17, %v175_v25  ;;  %39 = vperm.xlu0 %1448, %v27_v23   ;;  %49 = vperm.xlu1 %1449, %v29_v27   ;;  %v1567_v2 = vand.u32 4294901760, %v664_v60 }
   0x9   :  { %v183_v33 = vsub.f32 %v181_v18, %v182_v26  ;;  %v164_v36 = vand.u32 4294901760, %v163_v30  ;;  %v155_v42 = vsub.f32 %v153_v29, %v154_v35  ;;  %v1365_v49 = vpack.c.bf16 %v182_v26, %v175_v25 }
   0xa   :  { %v135_v34 = vsub.f32 %v133_v20, %v134_v28  ;;  %v145_v38 = vsub.f32 %v143_v24, %v144_v31  ;;  %v177_v39 = vand.u32 4294901760, %v176_v32  ;;  %v736_v3 = vsub.f32 %v664_v60, %v1567_v2 }
   0xb   :  { %v184_v40 = vand.u32 4294901760, %v183_v33  ;;  %v165_v43 = vsub.f32 %v163_v30, %v164_v36  ;;  %v156_v47 = vand.u32 4294901760, %v155_v42 }
   0xc   :  { %v136_v41 = vand.u32 4294901760, %v135_v34  ;;  %v146_v44 = vand.u32 4294901760, %v145_v38  ;;  %659 = vperm.xlu0 %1448, %v31_v37   ;;  %v737_v7 = vand.u32 4294901760, %v736_v3 }
   0xd   :  { %v1353_v45 = vpack.c.bf16 %v184_v40, %v177_v39  ;;  %v166_v48 = vand.u32 4294901760, %v165_v43 }
   0xe   :  { %1227 = vmatprep.mubr.f32.mxu0 %v136_v41 }
   0xf   :  { %1228 = vmatmul.mubr.f32.vlgmr.msra.gmra.mrb[0].mxu0 %v146_v44  ;;  %1354 = vmatprep.subr.bf16.mxu0 %v1353_v45 }
  0x10   :  { %1356 = vmatpush3.bf16.msra.mxu0 %v1353_v45  ;;  %1230 = vmatprep.mubr.f32.mxu0 %v156_v47 }
  0x11   :  { %1358 = vmatprep.subr.bf16.mxu0 %v1357_v46 }
  0x13   :  { %1231 = vmatmul.mubr.f32.gmra.mrb[2].mxu0 %v166_v48 }
  0x14   :  { %1237 = vmatprep.mubr.f32.mxu0 %v1511_v10 }
  0x17   :  { %1238 = vmatmul.mubr.f32.vlgmr.msra.gmra.mrb[0].mxu0 %v1521_v16 }
  0x18   :  { %1360 = vmatpush3.bf16.msra.mxu0 %v1357_v46  ;;  %1240 = vmatprep.mubr.f32.mxu0 %v1527_v21 }
  0x19   :  { %1362 = vmatprep.subr.bf16.mxu0 %v1519_v15 }
  0x1b   :  { %1241 = vmatmul.mubr.f32.gmra.mrb[2].mxu0 %v1529_v22 }
  0x1c   :  { %1247 = vmatprep.mubr.f32.mxu0 %v133_v20 }
  0x1f   :  { %1248 = vmatmul.mubr.f32.vlgmr.msra.gmra.mrb[0].mxu0 %v143_v24 }
  0x20   :  { %1364 = vmatpush3.bf16.msra.mxu0 %v1519_v15  ;;  %1250 = vmatprep.mubr.f32.mxu0 %v153_v29 }
  0x21   :  { %1366 = vmatprep.subr.bf16.mxu0 %v1365_v49 }
  0x23   :  { %1251 = vmatmul.mubr.f32.gmra.mrb[2].mxu0 %v163_v30 }
  0x24   :  { %1257 = vmatprep.mubr.f32.mxu0 %v134_v28 }
  0x27   :  { %1258 = vmatmul.mubr.f32.vlgmr.msra.gmra.mrb[0].mxu0 %v144_v31 }
  0x28   :  { %1368 = vmatpush3.bf16.msra.mxu0 %v1365_v49  ;;  %1260 = vmatprep.mubr.f32.mxu0 %v154_v35 }
  0x29   :  { %1370 = vmatprep.subr.bf16.mxu0 %v1519_v15 }
  0x2b   :  { %1261 = vmatmul.mubr.f32.gmra.mrb[2].mxu0 %v164_v36 }
  0x2c   :  { %1267 = vmatprep.mubr.f32.mxu0 %v1511_v10 }
  0x2f   :  { %1268 = vmatmul.mubr.f32.vlgmr.msra.gmra.mrb[0].mxu0 %v1521_v16 }
  0x30   :  { %1372 = vmatpush3.bf16.msra.mxu0 %v1519_v15  ;;  %1270 = vmatprep.mubr.f32.mxu0 %v1527_v21  ;;  %v738_v15 = vsub.f32 %v736_v3, %v737_v7 }
  0x32   :  { %v739_v26 = vand.u32 4294901760, %v738_v15 }
  0x33   :  { %1271 = vmatmul.mubr.f32.gmra.mrb[2].mxu0 %v1529_v22 }
  0x34   :  { %1277 = vmatprep.mubr.f32.mxu0 %v1511_v10 }
  0x37   :  { %1278 = vmatmul.mubr.f32.vlgmr.msra.gmra.mrb[0].mxu0 %v1521_v16 }
  0x38   :  { %1280 = vmatprep.mubr.f32.mxu0 %v1527_v21 }
  0x3b   :  { %1281 = vmatmul.mubr.f32.gmra.mrb[2].mxu0 %v1529_v22 }
  0x83   :  { %v35_v52 = vpop.permute.xlu0 %34  ;;  %v45_v53 = vpop.permute.xlu1 %44 }
  0x87   :  { %v40_v54 = vpop.permute.xlu0 %39  ;;  %v50_v61 = vpop.permute.xlu1 %49 }
  0x8b   :  { %v660_v39 = vpop.permute.xlu0 %659 }
 0x10a   :  { %v1279_v55 = vpop.f32.mrb[0].mxu0 }
 0x10b   :  { %v1409_v57 = vadd.f32 %v1279_v55, %v40_v54  ;;  %v631_v58 = vpop.f32.mrb[1].mxu0 }
 0x10c   :  { %v1410_v59 = vadd.f32 %v631_v58, %v35_v52 }
 0x10d   :  { %1450 = vtanh.f32 %v1409_v57 }
 0x10e   :  { %1452 = vtanh.f32 %v1410_v59  ;;  %v1282_v62 = vpop.f32.mrb[2].mxu0 }
 0x10f   :  { %v1411_v63 = vadd.f32 %v1282_v62, %v50_v61  ;;  %v643_v0 = vpop.f32.mrb[3].mxu0 }
 0x110   :  { %v1412_v1 = vadd.f32 %v643_v0, %v45_v53 }
 0x111   :  { %1454 = vtanh.f32 %v1411_v63 }
 0x112   :  { %1456 = vtanh.f32 %v1412_v1 }
 0x117   :  { %v1451_v4 = vpop.eup %1450 }
 0x118   :  { %v1453_v5 = vpop.eup %1452  ;;  %v670_v6 = vand.u32 4294901760, %v1451_v4 }
 0x119   :  { %v667_v8 = vand.u32 4294901760, %v1453_v5 }
 0x11a   :  { %v754_v9 = vsub.f32 %v1451_v4, %v670_v6 }
 0x11b   :  { %v1455_v10 = vpop.eup %1454  ;;  %v1374_v11 = vpack.c.bf16 %v670_v6, %v667_v8  ;;  %v747_v12 = vsub.f32 %v1453_v5, %v667_v8 }
 0x11c   :  { %v1457_v13 = vpop.eup %1456  ;;  %v676_v14 = vand.u32 4294901760, %v1455_v10  ;;  %v755_v16 = vand.u32 4294901760, %v754_v9 }
 0x11d   :  { %1375 = vmatpush3.bf16.msra.mxu1 %v1374_v11  ;;  %v673_v17 = vand.u32 4294901760, %v1457_v13  ;;  %v748_v18 = vand.u32 4294901760, %v747_v12  ;;  %v1386_v19 = vpack.c.bf16 %v754_v9, %v747_v12 }
 0x11e   :  { %1376 = vmatprep.subr.bf16.mxu1 %v1459_v50  ;;  %v768_v20 = vsub.f32 %v1455_v10, %v676_v14  ;;  %v756_v21 = vsub.f32 %v754_v9, %v755_v16 }
 0x11f   :  { %v1377_v22 = vpack.c.bf16 %v676_v14, %v673_v17  ;;  %v761_v23 = vsub.f32 %v1457_v13, %v673_v17  ;;  %v749_v24 = vsub.f32 %v747_v12, %v748_v18  ;;  %v1398_v25 = vpack.c.bf16 %v755_v16, %v748_v18 }
 0x120   :  { %v757_v27 = vand.u32 4294901760, %v756_v21  ;;  %v769_v28 = vand.u32 4294901760, %v768_v20 }
 0x121   :  { %1378 = vmatpush3.bf16.msra.mxu1 %v1377_v22  ;;  %v750_v29 = vand.u32 4294901760, %v749_v24  ;;  %v762_v30 = vand.u32 4294901760, %v761_v23  ;;  %v1389_v31 = vpack.c.bf16 %v768_v20, %v761_v23 }
 0x122   :  { %1379 = vmatprep.subr.bf16.mxu1 %v1459_v50  ;;  %v770_v32 = vsub.f32 %v768_v20, %v769_v28 }
 0x123   :  { %v1380_v33 = vpack.c.bf16 %v757_v27, %v750_v29  ;;  %v763_v34 = vsub.f32 %v761_v23, %v762_v30  ;;  %v1401_v35 = vpack.c.bf16 %v769_v28, %v762_v30 }
 0x124   :  { %1292 = vmatmul.mubr.f32.vlgmr.msra.gmra.mrb[0].mxu1 %v739_v26  ;;  %v771_v36 = vand.u32 4294901760, %v770_v32 }
 0x125   :  { %1381 = vmatpush3.bf16.msra.mxu1 %v1380_v33  ;;  %v764_v37 = vand.u32 4294901760, %v763_v34  ;;  %1302 = vmatprep.mubr.msk.f32.mxu1 %vm1460_vm1, %v1461_v51 }
 0x126   :  { %1382 = vmatprep.subr.bf16.mxu1 %v1459_v50 }
 0x127   :  { %v1383_v38 = vpack.c.bf16 %v771_v36, %v764_v37 }
 0x129   :  { %1384 = vmatpush3.bf16.msra.mxu1 %v1383_v38 }
 0x12a   :  { %1385 = vmatprep.subr.bf16.mxu1 %v1459_v50 }
 0x12c   :  { %1303 = vmatmul.mubr.f32.vlgmr.msra.gmra.mrb[0].mxu1 %v1567_v2 }
 0x12d   :  { %1387 = vmatpush3.bf16.msra.mxu1 %v1386_v19  ;;  %1313 = vmatprep.mubr.msk.f32.mxu1 %vm1460_vm1, %v1461_v51 }
 0x12e   :  { %1388 = vmatprep.subr.bf16.mxu1 %v1459_v50 }
 0x131   :  { %1390 = vmatpush3.bf16.msra.mxu1 %v1389_v31 }
 0x132   :  { %1391 = vmatprep.subr.bf16.mxu1 %v1459_v50 }
 0x134   :  { %1314 = vmatmul.mubr.f32.vlgmr.msra.gmra.mrb[0].mxu1 %v736_v3 }
 0x135   :  { %1393 = vmatpush3.bf16.msra.mxu1 %v1374_v11  ;;  %1324 = vmatprep.mubr.msk.f32.mxu1 %vm1460_vm1, %v1461_v51 }
 0x136   :  { %1394 = vmatprep.subr.bf16.mxu1 %v1459_v50 }
 0x139   :  { %1396 = vmatpush3.bf16.msra.mxu1 %v1377_v22 }
 0x13a   :  { %1397 = vmatprep.subr.bf16.mxu1 %v1459_v50 }
 0x13c   :  { %1325 = vmatmul.mubr.f32.vlgmr.msra.gmra.mrb[0].mxu1 %v737_v7 }
 0x13d   :  { %1399 = vmatpush3.bf16.msra.mxu1 %v1398_v25  ;;  %1335 = vmatprep.mubr.msk.f32.mxu1 %vm1460_vm1, %v1461_v51 }
 0x13e   :  { %1400 = vmatprep.subr.bf16.mxu1 %v1459_v50 }
 0x141   :  { %1402 = vmatpush3.bf16.msra.mxu1 %v1401_v35 }
 0x142   :  { %1403 = vmatprep.subr.bf16.mxu1 %v1459_v50 }
 0x144   :  { %1336 = vmatmul.mubr.f32.vlgmr.msra.gmra.mrb[0].mxu1 %v1567_v2 }
 0x145   :  { %1405 = vmatpush3.bf16.msra.mxu1 %v1374_v11  ;;  %1346 = vmatprep.mubr.msk.f32.mxu1 %vm1460_vm1, %v1461_v51 }
 0x146   :  { %1406 = vmatprep.subr.bf16.mxu1 %v1459_v50 }
 0x149   :  { %1408 = vmatpush3.bf16.msra.mxu1 %v1377_v22 }
 0x14c   :  { %1347 = vmatmul.mubr.f32.vlgmr.msra.gmra.mrb[0].mxu1 %v1567_v2 }
 0x21f   :  { %v1147_v40 = vpop.f32.mrb[0].mxu1 }
 0x220   :  { %v1413_v41 = vadd.f32 %v1147_v40, %v660_v39  ;;  %v1348_v42 = vpop.f32.mrb[1].mxu1 }
 0x222   :  { %1152 = vst.msk [vmem:[%s1602_s5] sm:$0xff] %vm1151_vm3, %v1413_v41 }

</bundles_post_ra>
